<compile_context>
chip_gen: v6e
topology: v6e:2x2x1
jax: 0.10.0
libtpu: 0.0.40
codegen_flags: <defaults>
</compile_context>

<pallas_src>
import jax
import jax.numpy as jnp
from jax.experimental import pallas as pl
from jax.experimental.pallas import tpu as pltpu


TM_MAX = 512  # rows per grid step (mem-bound sweet spot; see header for v5e/v6e notes)


def _round_up(x, m):
    return ((x + m - 1) // m) * m


def fc_kernel(x_ref, w_ref, b_ref, o_ref):
    # x_ref: (TM, ch)   w_ref: (ch, out)   b_ref: (1, out)   o_ref: (TM, out)
    # Canonical (TM,K)x(K,N) matmul -> MXU with f32 accumulation; bias + ReLU
    # on the VPU in f32 (safe on v5e which has no bf16 VALU).
    y = jnp.dot(x_ref[...], w_ref[...], preferred_element_type=jnp.float32)
    y = y + b_ref[...]
    o_ref[...] = jnp.maximum(y, 0.0).astype(o_ref.dtype)


def prepare_fc_params(weight, bias):
    """One-time parameter prep (run once, NOT per forward call):
    transpose the PyTorch-layout (out, ch) weight to (ch, out) so the kernel
    feeds the MXU in its preferred K-on-sublane orientation, and make bias 2D.
    """
    return jnp.asarray(weight).T, jnp.asarray(bias).reshape(1, -1)


def fc_forward(x, w_t, b2, dropout_rate=0.0):
    """Forward pass of FC (eval mode).

    x:   (bs, ch, pixel) float32
    w_t: (ch, out)       float32   (pre-transposed via prepare_fc_params)
    b2:  (1, out)        float32
    """
    del dropout_rate  # eval-mode dropout is identity
    bs, ch, pixel = x.shape
    out_dim = w_t.shape[1]

    # Matches torch: x.view(-1, ch) — raw row-major reshape.
    x2 = x.reshape(-1, ch)
    n_rows = x2.shape[0]

    # Row tiling with bounded padding waste (at most 8*ntiles padded rows).
    ntiles = pl.cdiv(_round_up(n_rows, 8), TM_MAX)
    tm = _round_up(pl.cdiv(n_rows, ntiles), 8)
    n_rows_p = ntiles * tm
    if n_rows_p != n_rows:  # skipped entirely when rows are already aligned
        x2 = jnp.pad(x2, ((0, n_rows_p - n_rows), (0, 0)))

    flops = 2 * n_rows_p * ch * out_dim
    bytes_accessed = 4 * (n_rows_p * ch + ch * out_dim + out_dim
                          + n_rows_p * out_dim)

    y = pl.pallas_call(
        fc_kernel,
        out_shape=jax.ShapeDtypeStruct((n_rows_p, out_dim), x.dtype),
        grid=(ntiles,),
        in_specs=[
            # Row tiles of x: pipelined (double-buffered) DMA.
            pl.BlockSpec((tm, ch), lambda i: (i, 0)),
            # Weight / bias: constant index_map -> DMA'd once, resident in
            # VMEM; single buffer (no point double-buffering a constant block).
            pl.BlockSpec((ch, out_dim), lambda i: (0, 0),
                         pipeline_mode=pl.Buffered(1)),
            pl.BlockSpec((1, out_dim), lambda i: (0, 0),
                         pipeline_mode=pl.Buffered(1)),
        ],
        # Unpadded feature dim (== full array dim): masked stores, but far
        # fewer HBM output bytes than padding out_dim up to 128 when it's tiny.
        out_specs=pl.BlockSpec((tm, out_dim), lambda i: (i, 0)),
        compiler_params=pltpu.CompilerParams(
            dimension_semantics=("parallel",)),   # v7x: shard row tiles over 2 TCs
        cost_estimate=pl.CostEstimate(flops=flops, transcendentals=0,
                                      bytes_accessed=bytes_accessed),
    )(x2, w_t, b2)

    if n_rows_p != n_rows:
        y = y[:n_rows]

    # Matches torch: x.view(bs, out, pixel) — raw row-major reshape.
    return y.reshape(bs, out_dim, pixel)


if __name__ == "__main__":
    # Small shapes consistent with the module's forward:
    #   input_dim == ch == 4, out == 8, bs == 2, pixel == 16
    bs, ch, pixel = 2, 4, 16
    input_dim, out_dim, dropout_rate = 4, 8, 0.5

    key = jax.random.PRNGKey(0)
    kx, kw, kb = jax.random.split(key, 3)

    x = jax.random.normal(kx, (bs, ch, pixel), dtype=jnp.float32)
    # Deterministic parameter init (uniform, roughly matching nn.Linear scale).
    bound = 1.0 / (input_dim ** 0.5)
    weight = jax.random.uniform(kw, (out_dim, input_dim), jnp.float32,
                                minval=-bound, maxval=bound)
    bias = jax.random.uniform(kb, (out_dim,), jnp.float32,
                              minval=-bound, maxval=bound)

    # One-time parameter preparation (transpose + 2D bias), then the kernel.
    w_t, b2 = prepare_fc_params(weight, bias)
    y = fc_forward(x, w_t, b2, dropout_rate)
    y = jax.block_until_ready(y)

    # Reference check in plain JAX (same math, same reshapes as torch module).
    ref = jnp.maximum(x.reshape(-1, ch) @ weight.T + bias, 0.0).reshape(
        bs, out_dim, pixel)
    assert y.shape == (bs, out_dim, pixel)
    assert jnp.allclose(y, ref, atol=1e-5, rtol=1e-5)

    print("KERNEL_OK")
</pallas_src>

<mosaic_0001>
module attributes {stable_mosaic.version = 11 : i64} {
  func.func @fc_kernel(%arg0: i32, %arg1: memref<32x4xf32, #tpu.memory_space<vmem>>, %arg2: memref<4x8xf32, #tpu.memory_space<vmem>>, %arg3: memref<1x8xf32, #tpu.memory_space<vmem>>, %arg4: memref<32x8xf32, #tpu.memory_space<vmem>>) attributes {dimension_semantics = [#tpu.dimension_semantics<parallel>], iteration_bounds = array<i64: 1>, scalar_prefetch = 0 : i64, scratch_operands = 0 : i64, tpu.core_type = #tpu.core_type<tc>, window_params = [{transform_indices = @transform_0, window_bounds = array<i64: 32, 4>}, {pipeline_mode = #tpu.pipeline_mode<synchronous>, transform_indices = @transform_1, window_bounds = array<i64: 4, 8>}, {pipeline_mode = #tpu.pipeline_mode<synchronous>, transform_indices = @transform_2, window_bounds = array<i64: 1, 8>}, {transform_indices = @transform_3, window_bounds = array<i64: 32, 8>}]} {
    %c0 = arith.constant 0 : index
    %c0_0 = arith.constant 0 : index
    %0 = vector.load %arg1[%c0, %c0_0] : memref<32x4xf32, #tpu.memory_space<vmem>>, vector<32x4xf32>
    %c0_1 = arith.constant 0 : index
    %c0_2 = arith.constant 0 : index
    %1 = vector.load %arg2[%c0_1, %c0_2] : memref<4x8xf32, #tpu.memory_space<vmem>>, vector<4x8xf32>
    %cst = arith.constant dense<0.000000e+00> : vector<32x8xf32>
    %2 = tpu.matmul %0, %1, %cst {dimension_numbers = #tpu.dot_dimension_numbers<[1], [0], [0], [1], [0, 0, 1, 1], [], []>} : vector<32x4xf32>, vector<4x8xf32>, vector<32x8xf32> -> vector<32x8xf32>
    %c0_3 = arith.constant 0 : index
    %c0_4 = arith.constant 0 : index
    %3 = vector.load %arg3[%c0_3, %c0_4] : memref<1x8xf32, #tpu.memory_space<vmem>>, vector<1x8xf32>
    %4 = vector.broadcast %3 : vector<1x8xf32> to vector<32x8xf32>
    %5 = arith.addf %2, %4 : vector<32x8xf32>
    %cst_5 = arith.constant 0.000000e+00 : f32
    %6 = vector.broadcast %cst_5 : f32 to vector<32x8xf32>
    %7 = arith.maximumf %5, %6 : vector<32x8xf32>
    %c0_6 = arith.constant 0 : index
    %c0_7 = arith.constant 0 : index
    %8 = vector.load %arg4[%c0_6, %c0_7] : memref<32x8xf32, #tpu.memory_space<vmem>>, vector<32x8xf32>
    tpu.vector_store %arg4[%c0_6, %c0_7], %7 {strides = array<i32>} : memref<32x8xf32, #tpu.memory_space<vmem>>, vector<32x8xf32>,
    return
  }
  func.func @transform_0(%arg0: i32) -> (i32, i32) {
    %c0_i32 = arith.constant 0 : i32
    %c0_i32_0 = arith.constant 0 : i32
    return %arg0, %c0_i32 : i32, i32
  }
  func.func @transform_1(%arg0: i32) -> (i32, i32) {
    %c0_i32 = arith.constant 0 : i32
    %c0_i32_0 = arith.constant 0 : i32
    %c0_i32_1 = arith.constant 0 : i32
    return %c0_i32, %c0_i32_0 : i32, i32
  }
  func.func @transform_2(%arg0: i32) -> (i32, i32) {
    %c0_i32 = arith.constant 0 : i32
    %c0_i32_0 = arith.constant 0 : i32
    %c0_i32_1 = arith.constant 0 : i32
    return %c0_i32, %c0_i32_0 : i32, i32
  }
  func.func @transform_3(%arg0: i32) -> (i32, i32) {
    %c0_i32 = arith.constant 0 : i32
    %c0_i32_0 = arith.constant 0 : i32
    return %arg0, %c0_i32 : i32, i32
  }
}

</mosaic_0001>

<bundles_post_ra>
// kernel: tpu_custom_call.1
= control target key start
LH: loop header
LB: loop body
LE: loop exit
PB: predicated region body
PF: predicated region fallthrough
CT: control target
= control target key end

     0   :  { %vm39_vm0 = vcmask 1043456   ;;  %vm26_vm1 = vcmask 31744   ;;  %vm132_vm2 = vcmask 64512   ;;  %s212_s1 = inlined_call_operand.vmem [shape: f32[4,8], index: 1, kind: input, shape index: {}]   ;;  %s213_s0 = inlined_call_operand.vmem [shape: f32[32,4], index: 0, kind: input, shape index: {}]   ;;  %s214_s2 = inlined_call_operand.vmem [shape: f32[1,8], index: 2, kind: input, shape index: {}]   ;;  %s215_s3 = inlined_call_operand.vmem [shape: f32[32,8], index: 3, kind: output, shape index: {}]  }
   0x1   :  { %v18_v0 = vld [vmem:[%s212_s1] sm:$0xf]  ;;  %v16_v2 = vld [vmem:[%s213_s0 + $0x10] sm:$0xff]  ;;  %v15_v3 = vld [vmem:[%s213_s0 + $0x8] sm:$0xff] }
   0x2   :  { %v14_v1 = vld [vmem:[%s213_s0] sm:$0xff]  ;;  %152 = vmatprep.subr.msk.mxu0 %vm39_vm0, %v18_v0  ;;  %160 = vmatprep.subr.msk.mxu1 %vm39_vm0, %v18_v0  ;;  %v17_v4 = vld [vmem:[%s213_s0 + $0x18] sm:$0xff] }
   0x3   :  { %153 = vmatpush3.msk.msra.mxu0 %vm39_vm0, %v18_v0  ;;  %161 = vmatpush3.msk.msra.mxu1 %vm39_vm0, %v18_v0  ;;  %v141_v5 = vld [vmem:[%s214_s2] ss:$0 sm:$0xff] }
   0x4   :  { %154 = vmatprep.mubr.msk.f32.mxu0 %vm26_vm1, %v14_v1  ;;  %157 = vmatprep.mubr.msk.f32.mxu1 %vm26_vm1, %v16_v2 }
   0x5   :  { %155 = vmatmul.mubr.msk.f32.vlgmr.msra.gmra.mxu0 %vm26_vm1, %v15_v3  ;;  %158 = vmatmul.mubr.msk.f32.vlgmr.msra.gmra.mxu1 %vm26_vm1, %v17_v4 }
  0xc5   :  { %v156_v6 = vpop.f32.mrf.mxu0  ;;  %v159_v7 = vpop.f32.mrf.mxu1 }
  0xc6   :  { %v115_v8 = vadd.f32 %v156_v6, %v141_v5  ;;  %v125_v9 = vadd.f32 %v159_v7, %v141_v5 }
  0xc7   :  { %v109_v10 = vpop.f32.mrf.mxu0  ;;  %v119_v11 = vpop.f32.mrf.mxu1 }
  0xc8   :  { %v129_v12 = vmax.f32 %v115_v8, 0.0  ;;  %v131_v13 = vmax.f32 %v125_v9, 0.0  ;;  %v110_v14 = vadd.f32 %v141_v5, %v109_v10  ;;  %v120_v15 = vadd.f32 %v141_v5, %v119_v11 }
  0xca   :  { %134 = vst.msk [vmem:[%s215_s3 + $0x8] sm:$0xff] %vm132_vm2, %v129_v12  ;;  %136 = vst.msk [vmem:[%s215_s3 + $0x18] sm:$0xff] %vm132_vm2, %v131_v13  ;;  %v128_v16 = vmax.f32 %v110_v14, 0.0  ;;  %v130_v17 = vmax.f32 %v120_v15, 0.0 }
  0xcc   :  { %133 = vst.msk [vmem:[%s215_s3] sm:$0xff] %vm132_vm2, %v128_v16  ;;  %135 = vst.msk [vmem:[%s215_s3 + $0x10] sm:$0xff] %vm132_vm2, %v130_v17 }

</bundles_post_ra>
